<compile_context>
chip_gen: v6e
topology: v6e:2x2x1
jax: 0.10.0
libtpu: 0.0.40
codegen_flags: <defaults>
</compile_context>

<pallas_src>
import functools

import jax
import jax.numpy as jnp
from jax.experimental import pallas as pl
from jax.experimental.pallas import tpu as pltpu


def _erf(x):
    """erf via Abramowitz & Stegun 7.1.26 (max abs error ~1.5e-7)."""
    p = 0.3275911
    a1, a2, a3, a4, a5 = (0.254829592, -0.284496736, 1.421413741,
                          -1.453152027, 1.061405429)
    ax = jnp.abs(x)
    # Exact divide kept on purpose (see header note on pl.reciprocal).
    t = 1.0 / (1.0 + p * ax)
    poly = t * (a1 + t * (a2 + t * (a3 + t * (a4 + t * a5))))
    y = 1.0 - poly * jnp.exp(-(ax * ax))
    return jnp.where(x < 0.0, -y, y)


def _gelu_exact(x):
    # nn.GELU() default: 0.5 * x * (1 + erf(x / sqrt(2)))
    return 0.5 * x * (1.0 + _erf(x * 0.7071067811865476))


def _cmlp_kernel(x_ref, w1_ref, b1_ref, w2_ref, b2_ref, o_ref, *, batch, c_in):
    """Fused 1x1-conv MLP over all batch elements in one invocation.

    x_ref:  (B*C_in,  HW_pad) f32  -- channels on sublanes, spatial on lanes
    w1_ref: (C_hid, C_in)     f32
    b1_ref: (C_hid, 1)        f32
    w2_ref: (C_out, C_hid)    f32
    b2_ref: (C_out, 1)        f32
    o_ref:  (B*C_out, HW_pad) f32  -- lane-dense, full-tile output block
    """
    w1 = w1_ref[...]
    b1 = b1_ref[...]
    w2 = w2_ref[...]
    b2 = b2_ref[...]

    outs = []
    for b in range(batch):                          # statically unrolled (B=2)
        xb = x_ref[b * c_in:(b + 1) * c_in, :]      # (C_in, HW) static slice
        # fc1 (1x1 conv): K = c_in = 4 -> broadcast FMAs on the VPU instead of
        # an MXU matmul (avoids a <4%-utilized vmatmul + MRF pop on the
        # critical path of this latency-bound kernel).
        h = w1[:, 0:1] * xb[0:1, :]
        for c in range(1, c_in):
            h = h + w1[:, c:c + 1] * xb[c:c + 1, :]
        h = h + b1
        h = _gelu_exact(h)
        # TODO(synk): nn.Dropout with drop > 0 in training mode is not
        # implemented; drop=0.0 (module default) / eval mode => identity.
        # fc2 (1x1 conv): K = C_hid = 32 -> keep on the MXU.
        yb = jnp.dot(w2, h, preferred_element_type=jnp.float32) + b2
        outs.append(yb)

    # One lane-dense, exactly-full-tile store of the whole output.
    o_ref[...] = jnp.concatenate(outs, axis=0).astype(o_ref.dtype)


def cmlp_forward(x, w1, b1, w2, b2):
    """CMlp forward.

    x:  (B, C_in, H, W) f32 (NCHW, as in PyTorch)
    w1: (C_hid, C_in), b1: (C_hid,)   -- fc1 (1x1 conv)
    w2: (C_out, C_hid), b2: (C_out,)  -- fc2 (1x1 conv)
    returns (B, C_out, H, W) f32
    """
    B, C_in, H, W = x.shape
    C_hid = w1.shape[0]
    C_out = w2.shape[0]
    HW = H * W
    # Pad the flattened spatial dim to a multiple of 128 so the output block is
    # never lane-sparse (no-op for 16x16=256; protects 14x14 / 7x7 stages).
    HW_pad = ((HW + 127) // 128) * 128

    x2 = x.reshape(B * C_in, HW)                    # free reshape, no transpose
    if HW_pad != HW:
        x2 = jnp.pad(x2, ((0, 0), (0, HW_pad - HW)))
    b1c = b1.reshape(C_hid, 1)
    b2c = b2.reshape(C_out, 1)

    kernel = functools.partial(_cmlp_kernel, batch=B, c_in=C_in)

    # No grid: the whole problem (~20 KiB of f32) is one full-tile VMEM block.
    # At production sizes (C >= 128, large H*W) add an HW-tile "parallel" grid
    # axis sized to the per-generation VMEM limit and cast matmul inputs to
    # bf16; unnecessary (pure overhead) at these shapes.
    out2 = pl.pallas_call(
        kernel,
        out_shape=jax.ShapeDtypeStruct((B * C_out, HW_pad), x.dtype),
        in_specs=[pl.BlockSpec(memory_space=pltpu.MemorySpace.VMEM)
                  for _ in range(5)],
        out_specs=pl.BlockSpec(memory_space=pltpu.MemorySpace.VMEM),
    )(x2, w1, b1c, w2, b2c)

    if HW_pad != HW:
        out2 = out2[:, :HW]
    return out2.reshape(B, C_out, H, W)


def _cmlp_reference(x, w1, b1, w2, b2):
    """Pure-JAX reference mirroring the PyTorch module (exact erf GELU)."""
    h = jnp.einsum("oi,bihw->bohw", w1, x) + b1[None, :, None, None]
    h = jax.nn.gelu(h, approximate=False)
    y = jnp.einsum("oi,bihw->bohw", w2, h) + b2[None, :, None, None]
    return y


if __name__ == "__main__":
    # Small shapes consistent with the module: B=2, C_in=C_out=4, hidden=32, 16x16.
    B, C_in, C_hid, C_out, H, W = 2, 4, 32, 4, 16, 16

    key = jax.random.PRNGKey(0)
    kx, kw1, kb1, kw2, kb2 = jax.random.split(key, 5)
    x = jax.random.normal(kx, (B, C_in, H, W), dtype=jnp.float32)
    w1 = jax.random.normal(kw1, (C_hid, C_in), dtype=jnp.float32) / jnp.sqrt(C_in)
    b1 = jax.random.normal(kb1, (C_hid,), dtype=jnp.float32) * 0.1
    w2 = jax.random.normal(kw2, (C_out, C_hid), dtype=jnp.float32) / jnp.sqrt(C_hid)
    b2 = jax.random.normal(kb2, (C_out,), dtype=jnp.float32) * 0.1

    out = cmlp_forward(x, w1, b1, w2, b2)
    out = jax.block_until_ready(out)

    ref = _cmlp_reference(x, w1, b1, w2, b2)

    assert out.shape == (B, C_out, H, W), out.shape
    assert jnp.allclose(out, ref, atol=1e-4, rtol=1e-4), (
        "mismatch vs reference: max abs diff = %e"
        % float(jnp.max(jnp.abs(out - ref)))
    )

    print("KERNEL_OK")
</pallas_src>

<mosaic_0001>
module attributes {stable_mosaic.version = 11 : i64} {
  func.func @_cmlp_kernel(%arg0: memref<8x256xf32, #tpu.memory_space<vmem>>, %arg1: memref<32x4xf32, #tpu.memory_space<vmem>>, %arg2: memref<32x1xf32, #tpu.memory_space<vmem>>, %arg3: memref<4x32xf32, #tpu.memory_space<vmem>>, %arg4: memref<4x1xf32, #tpu.memory_space<vmem>>, %arg5: memref<8x256xf32, #tpu.memory_space<vmem>>) attributes {dimension_semantics = [], scalar_prefetch = 0 : i64, scratch_operands = 0 : i64, tpu.core_type = #tpu.core_type<tc>} {
    %c0 = arith.constant 0 : index
    %c0_0 = arith.constant 0 : index
    %0 = vector.load %arg1[%c0, %c0_0] : memref<32x4xf32, #tpu.memory_space<vmem>>, vector<32x4xf32>
    %c0_1 = arith.constant 0 : index
    %c0_2 = arith.constant 0 : index
    %1 = vector.load %arg2[%c0_1, %c0_2] : memref<32x1xf32, #tpu.memory_space<vmem>>, vector<32x1xf32>
    %c0_3 = arith.constant 0 : index
    %c0_4 = arith.constant 0 : index
    %2 = vector.load %arg3[%c0_3, %c0_4] : memref<4x32xf32, #tpu.memory_space<vmem>>, vector<4x32xf32>
    %c0_5 = arith.constant 0 : index
    %c0_6 = arith.constant 0 : index
    %3 = vector.load %arg4[%c0_5, %c0_6] : memref<4x1xf32, #tpu.memory_space<vmem>>, vector<4x1xf32>
    %c0_7 = arith.constant 0 : index
    %c0_8 = arith.constant 0 : index
    %4 = vector.load %arg0[%c0_7, %c0_8] : memref<8x256xf32, #tpu.memory_space<vmem>>, vector<4x256xf32>
    %5 = vector.extract_strided_slice %0 {offsets = [0, 0], sizes = [32, 1], strides = [1, 1]} : vector<32x4xf32> to vector<32x1xf32>
    %6 = vector.extract_strided_slice %4 {offsets = [0, 0], sizes = [1, 256], strides = [1, 1]} : vector<4x256xf32> to vector<1x256xf32>
    %7 = vector.broadcast %5 : vector<32x1xf32> to vector<32x256xf32>
    %8 = vector.broadcast %6 : vector<1x256xf32> to vector<32x256xf32>
    %9 = arith.mulf %7, %8 : vector<32x256xf32>
    %10 = vector.extract_strided_slice %0 {offsets = [0, 1], sizes = [32, 1], strides = [1, 1]} : vector<32x4xf32> to vector<32x1xf32>
    %11 = vector.extract_strided_slice %4 {offsets = [1, 0], sizes = [1, 256], strides = [1, 1]} : vector<4x256xf32> to vector<1x256xf32>
    %12 = vector.broadcast %10 : vector<32x1xf32> to vector<32x256xf32>
    %13 = vector.broadcast %11 : vector<1x256xf32> to vector<32x256xf32>
    %14 = arith.mulf %12, %13 : vector<32x256xf32>
    %15 = arith.addf %9, %14 : vector<32x256xf32>
    %16 = vector.extract_strided_slice %0 {offsets = [0, 2], sizes = [32, 1], strides = [1, 1]} : vector<32x4xf32> to vector<32x1xf32>
    %17 = vector.extract_strided_slice %4 {offsets = [2, 0], sizes = [1, 256], strides = [1, 1]} : vector<4x256xf32> to vector<1x256xf32>
    %18 = vector.broadcast %16 : vector<32x1xf32> to vector<32x256xf32>
    %19 = vector.broadcast %17 : vector<1x256xf32> to vector<32x256xf32>
    %20 = arith.mulf %18, %19 : vector<32x256xf32>
    %21 = arith.addf %15, %20 : vector<32x256xf32>
    %22 = vector.extract_strided_slice %0 {offsets = [0, 3], sizes = [32, 1], strides = [1, 1]} : vector<32x4xf32> to vector<32x1xf32>
    %23 = vector.extract_strided_slice %4 {offsets = [3, 0], sizes = [1, 256], strides = [1, 1]} : vector<4x256xf32> to vector<1x256xf32>
    %24 = vector.broadcast %22 : vector<32x1xf32> to vector<32x256xf32>
    %25 = vector.broadcast %23 : vector<1x256xf32> to vector<32x256xf32>
    %26 = arith.mulf %24, %25 : vector<32x256xf32>
    %27 = arith.addf %21, %26 : vector<32x256xf32>
    %28 = vector.broadcast %1 : vector<32x1xf32> to vector<32x256xf32>
    %29 = arith.addf %27, %28 : vector<32x256xf32>
    %cst = arith.constant 5.000000e-01 : f32
    %30 = vector.broadcast %cst : f32 to vector<32x256xf32>
    %31 = arith.mulf %30, %29 : vector<32x256xf32>
    %cst_9 = arith.constant 0.707106769 : f32
    %32 = vector.broadcast %cst_9 : f32 to vector<32x256xf32>
    %33 = arith.mulf %29, %32 : vector<32x256xf32>
    %34 = math.absf %33 : vector<32x256xf32>
    %cst_10 = arith.constant 0.327591091 : f32
    %35 = vector.broadcast %cst_10 : f32 to vector<32x256xf32>
    %36 = arith.mulf %35, %34 : vector<32x256xf32>
    %cst_11 = arith.constant 1.000000e+00 : f32
    %37 = vector.broadcast %cst_11 : f32 to vector<32x256xf32>
    %38 = arith.addf %37, %36 : vector<32x256xf32>
    %cst_12 = arith.constant 1.000000e+00 : f32
    %39 = vector.broadcast %cst_12 : f32 to vector<32x256xf32>
    %40 = arith.divf %39, %38 : vector<32x256xf32>
    %cst_13 = arith.constant 1.06140542 : f32
    %41 = vector.broadcast %cst_13 : f32 to vector<32x256xf32>
    %42 = arith.mulf %40, %41 : vector<32x256xf32>
    %cst_14 = arith.constant -1.45315206 : f32
    %43 = vector.broadcast %cst_14 : f32 to vector<32x256xf32>
    %44 = arith.addf %43, %42 : vector<32x256xf32>
    %45 = arith.mulf %40, %44 : vector<32x256xf32>
    %cst_15 = arith.constant 1.42141378 : f32
    %46 = vector.broadcast %cst_15 : f32 to vector<32x256xf32>
    %47 = arith.addf %46, %45 : vector<32x256xf32>
    %48 = arith.mulf %40, %47 : vector<32x256xf32>
    %cst_16 = arith.constant -0.284496725 : f32
    %49 = vector.broadcast %cst_16 : f32 to vector<32x256xf32>
    %50 = arith.addf %49, %48 : vector<32x256xf32>
    %51 = arith.mulf %40, %50 : vector<32x256xf32>
    %cst_17 = arith.constant 0.254829586 : f32
    %52 = vector.broadcast %cst_17 : f32 to vector<32x256xf32>
    %53 = arith.addf %52, %51 : vector<32x256xf32>
    %54 = arith.mulf %40, %53 : vector<32x256xf32>
    %55 = arith.mulf %34, %34 : vector<32x256xf32>
    %cst_18 = arith.constant 0.000000e+00 : f32
    %56 = vector.broadcast %cst_18 : f32 to vector<32x256xf32>
    %57 = arith.subf %56, %55 : vector<32x256xf32>
    %58 = math.exp %57 : vector<32x256xf32>
    %59 = arith.mulf %54, %58 : vector<32x256xf32>
    %cst_19 = arith.constant 1.000000e+00 : f32
    %60 = vector.broadcast %cst_19 : f32 to vector<32x256xf32>
    %61 = arith.subf %60, %59 : vector<32x256xf32>
    %cst_20 = arith.constant 0.000000e+00 : f32
    %62 = vector.broadcast %cst_20 : f32 to vector<32x256xf32>
    %63 = arith.cmpf olt, %33, %62 : vector<32x256xf32>
    %cst_21 = arith.constant 0.000000e+00 : f32
    %64 = vector.broadcast %cst_21 : f32 to vector<32x256xf32>
    %65 = arith.subf %64, %61 : vector<32x256xf32>
    %66 = arith.select %63, %65, %61 : vector<32x256xi1>, vector<32x256xf32>
    %cst_22 = arith.constant 1.000000e+00 : f32
    %67 = vector.broadcast %cst_22 : f32 to vector<32x256xf32>
    %68 = arith.addf %67, %66 : vector<32x256xf32>
    %69 = arith.mulf %31, %68 : vector<32x256xf32>
    %cst_23 = arith.constant dense<0.000000e+00> : vector<4x256xf32>
    %70 = tpu.matmul %2, %69, %cst_23 {dimension_numbers = #tpu.dot_dimension_numbers<[1], [0], [0], [1], [0, 0, 1, 1], [], []>} : vector<4x32xf32>, vector<32x256xf32>, vector<4x256xf32> -> vector<4x256xf32>
    %71 = vector.broadcast %3 : vector<4x1xf32> to vector<4x256xf32>
    %72 = arith.addf %70, %71 : vector<4x256xf32>
    %c4 = arith.constant 4 : index
    %c0_24 = arith.constant 0 : index
    %73 = vector.load %arg0[%c4, %c0_24] : memref<8x256xf32, #tpu.memory_space<vmem>>, vector<4x256xf32>
    %74 = vector.extract_strided_slice %0 {offsets = [0, 0], sizes = [32, 1], strides = [1, 1]} : vector<32x4xf32> to vector<32x1xf32>
    %75 = vector.extract_strided_slice %73 {offsets = [0, 0], sizes = [1, 256], strides = [1, 1]} : vector<4x256xf32> to vector<1x256xf32>
    %76 = vector.broadcast %74 : vector<32x1xf32> to vector<32x256xf32>
    %77 = vector.broadcast %75 : vector<1x256xf32> to vector<32x256xf32>
    %78 = arith.mulf %76, %77 : vector<32x256xf32>
    %79 = vector.extract_strided_slice %0 {offsets = [0, 1], sizes = [32, 1], strides = [1, 1]} : vector<32x4xf32> to vector<32x1xf32>
    %80 = vector.extract_strided_slice %73 {offsets = [1, 0], sizes = [1, 256], strides = [1, 1]} : vector<4x256xf32> to vector<1x256xf32>
    %81 = vector.broadcast %79 : vector<32x1xf32> to vector<32x256xf32>
    %82 = vector.broadcast %80 : vector<1x256xf32> to vector<32x256xf32>
    %83 = arith.mulf %81, %82 : vector<32x256xf32>
    %84 = arith.addf %78, %83 : vector<32x256xf32>
    %85 = vector.extract_strided_slice %0 {offsets = [0, 2], sizes = [32, 1], strides = [1, 1]} : vector<32x4xf32> to vector<32x1xf32>
    %86 = vector.extract_strided_slice %73 {offsets = [2, 0], sizes = [1, 256], strides = [1, 1]} : vector<4x256xf32> to vector<1x256xf32>
    %87 = vector.broadcast %85 : vector<32x1xf32> to vector<32x256xf32>
    %88 = vector.broadcast %86 : vector<1x256xf32> to vector<32x256xf32>
    %89 = arith.mulf %87, %88 : vector<32x256xf32>
    %90 = arith.addf %84, %89 : vector<32x256xf32>
    %91 = vector.extract_strided_slice %0 {offsets = [0, 3], sizes = [32, 1], strides = [1, 1]} : vector<32x4xf32> to vector<32x1xf32>
    %92 = vector.extract_strided_slice %73 {offsets = [3, 0], sizes = [1, 256], strides = [1, 1]} : vector<4x256xf32> to vector<1x256xf32>
    %93 = vector.broadcast %91 : vector<32x1xf32> to vector<32x256xf32>
    %94 = vector.broadcast %92 : vector<1x256xf32> to vector<32x256xf32>
    %95 = arith.mulf %93, %94 : vector<32x256xf32>
    %96 = arith.addf %90, %95 : vector<32x256xf32>
    %97 = vector.broadcast %1 : vector<32x1xf32> to vector<32x256xf32>
    %98 = arith.addf %96, %97 : vector<32x256xf32>
    %cst_25 = arith.constant 5.000000e-01 : f32
    %99 = vector.broadcast %cst_25 : f32 to vector<32x256xf32>
    %100 = arith.mulf %99, %98 : vector<32x256xf32>
    %cst_26 = arith.constant 0.707106769 : f32
    %101 = vector.broadcast %cst_26 : f32 to vector<32x256xf32>
    %102 = arith.mulf %98, %101 : vector<32x256xf32>
    %103 = math.absf %102 : vector<32x256xf32>
    %cst_27 = arith.constant 0.327591091 : f32
    %104 = vector.broadcast %cst_27 : f32 to vector<32x256xf32>
    %105 = arith.mulf %104, %103 : vector<32x256xf32>
    %cst_28 = arith.constant 1.000000e+00 : f32
    %106 = vector.broadcast %cst_28 : f32 to vector<32x256xf32>
    %107 = arith.addf %106, %105 : vector<32x256xf32>
    %cst_29 = arith.constant 1.000000e+00 : f32
    %108 = vector.broadcast %cst_29 : f32 to vector<32x256xf32>
    %109 = arith.divf %108, %107 : vector<32x256xf32>
    %cst_30 = arith.constant 1.06140542 : f32
    %110 = vector.broadcast %cst_30 : f32 to vector<32x256xf32>
    %111 = arith.mulf %109, %110 : vector<32x256xf32>
    %cst_31 = arith.constant -1.45315206 : f32
    %112 = vector.broadcast %cst_31 : f32 to vector<32x256xf32>
    %113 = arith.addf %112, %111 : vector<32x256xf32>
    %114 = arith.mulf %109, %113 : vector<32x256xf32>
    %cst_32 = arith.constant 1.42141378 : f32
    %115 = vector.broadcast %cst_32 : f32 to vector<32x256xf32>
    %116 = arith.addf %115, %114 : vector<32x256xf32>
    %117 = arith.mulf %109, %116 : vector<32x256xf32>
    %cst_33 = arith.constant -0.284496725 : f32
    %118 = vector.broadcast %cst_33 : f32 to vector<32x256xf32>
    %119 = arith.addf %118, %117 : vector<32x256xf32>
    %120 = arith.mulf %109, %119 : vector<32x256xf32>
    %cst_34 = arith.constant 0.254829586 : f32
    %121 = vector.broadcast %cst_34 : f32 to vector<32x256xf32>
    %122 = arith.addf %121, %120 : vector<32x256xf32>
    %123 = arith.mulf %109, %122 : vector<32x256xf32>
    %124 = arith.mulf %103, %103 : vector<32x256xf32>
    %cst_35 = arith.constant 0.000000e+00 : f32
    %125 = vector.broadcast %cst_35 : f32 to vector<32x256xf32>
    %126 = arith.subf %125, %124 : vector<32x256xf32>
    %127 = math.exp %126 : vector<32x256xf32>
    %128 = arith.mulf %123, %127 : vector<32x256xf32>
    %cst_36 = arith.constant 1.000000e+00 : f32
    %129 = vector.broadcast %cst_36 : f32 to vector<32x256xf32>
    %130 = arith.subf %129, %128 : vector<32x256xf32>
    %cst_37 = arith.constant 0.000000e+00 : f32
    %131 = vector.broadcast %cst_37 : f32 to vector<32x256xf32>
    %132 = arith.cmpf olt, %102, %131 : vector<32x256xf32>
    %cst_38 = arith.constant 0.000000e+00 : f32
    %133 = vector.broadcast %cst_38 : f32 to vector<32x256xf32>
    %134 = arith.subf %133, %130 : vector<32x256xf32>
    %135 = arith.select %132, %134, %130 : vector<32x256xi1>, vector<32x256xf32>
    %cst_39 = arith.constant 1.000000e+00 : f32
    %136 = vector.broadcast %cst_39 : f32 to vector<32x256xf32>
    %137 = arith.addf %136, %135 : vector<32x256xf32>
    %138 = arith.mulf %100, %137 : vector<32x256xf32>
    %cst_40 = arith.constant dense<0.000000e+00> : vector<4x256xf32>
    %139 = tpu.matmul %2, %138, %cst_40 {dimension_numbers = #tpu.dot_dimension_numbers<[1], [0], [0], [1], [0, 0, 1, 1], [], []>} : vector<4x32xf32>, vector<32x256xf32>, vector<4x256xf32> -> vector<4x256xf32>
    %140 = vector.broadcast %3 : vector<4x1xf32> to vector<4x256xf32>
    %141 = arith.addf %139, %140 : vector<4x256xf32>
    %142 = tpu.concatenate %72, %141 in 0 : vector<4x256xf32>, vector<4x256xf32> -> vector<8x256xf32>
    %c0_41 = arith.constant 0 : index
    %c0_42 = arith.constant 0 : index
    %143 = vector.load %arg5[%c0_41, %c0_42] : memref<8x256xf32, #tpu.memory_space<vmem>>, vector<8x256xf32>
    tpu.vector_store %arg5[%c0_41, %c0_42], %142 {strides = array<i32>} : memref<8x256xf32, #tpu.memory_space<vmem>>, vector<8x256xf32>,
    return
  }
}

</mosaic_0001>

<bundles_post_ra>
// kernel: tpu_custom_call.1
= control target key start
LH: loop header
LB: loop body
LE: loop exit
PB: predicated region body
PF: predicated region fallthrough
CT: control target
= control target key end

     0   :  { %v1034_v2 = vmov 1   ;;  %v1035_v3 = vmov 0   ;;  %s1571_s0 = inlined_call_operand.vmem [shape: f32[8,256], index: 0, kind: input, shape index: {}]   ;;  %s1572_s1 = inlined_call_operand.vmem [shape: f32[32,4], index: 1, kind: input, shape index: {}]   ;;  %s1573_s2 = inlined_call_operand.vmem [shape: f32[32,1], index: 2, kind: input, shape index: {}]   ;;  %s1574_s3 = inlined_call_operand.vmem [shape: f32[4,32], index: 3, kind: input, shape index: {}]   ;;  %s1575_s4 = inlined_call_operand.vmem [shape: f32[4,1], index: 4, kind: input, shape index: {}]   ;;  %s1576_s5 = inlined_call_operand.hbm [shape: f32[8,256], index: 5, kind: output, shape index: {}]  }
   0x1   :  { %v24_v0 = vld [vmem:[%s1572_s1 + $0x18] sm:$0xff]  ;;  %v23_v1 = vld [vmem:[%s1572_s1 + $0x10] sm:$0xff]  ;;  %931 = vset.pattern.permute.xlu0 %v1034_v2  ;;  %933 = vset.pattern.permute.xlu1 %v1035_v3 }
   0x2   :  { %82 = vperm.xlu0 %931, %v24_v0   ;;  %45 = vperm.xlu1 %933, %v23_v1  }
   0x3   :  { %10 = vsyncpa [#allocation3], 0  ;;  %v22_v4 = vld [vmem:[%s1572_s1 + $0x8] sm:$0xff]  ;;  %v1036_v5 = vmov 2   ;;  %v1037_v6 = vmov 3   ;;  %v21_v7 = vld [vmem:[%s1572_s1] sm:$0xff]  ;;  %v53_v15 = vlaneseq }
   0x4   :  { %v27_v8 = vld [vmem:[%s1573_s2 + $0x10] sm:$0xff]  ;;  %v30_v9 = vld [vmem:[%s1575_s4] sm:$0xf]  ;;  %v28_v10 = vld [vmem:[%s1573_s2 + $0x18] sm:$0xff]  ;;  %s1039_s17 = smov [#allocation2]  }
   0x5   :  { %v26_v11 = vld [vmem:[%s1573_s2 + $0x8] sm:$0xff]  ;;  %v25_v12 = vld [vmem:[%s1573_s2] sm:$0xff]  ;;  %v54_v17 = vshrl.u32 %v53_v15, 7  ;;  %s915_s18 = sshll.u32 %s1039_s17, 4  ;;  %s916_s18 = int_to_ptr.vmem [resolvable:$true] %s915_s18 }
   0x6   :  { %932 = vset.pattern.permute.xlu0 %v1035_v3  ;;  %934 = vset.pattern.permute.xlu1 %v1034_v2  ;;  %v31_v21 = vld [vmem:[%s1571_s0] sm:$0xf]  ;;  %v32_v24 = vld [vmem:[%s1571_s0 + $0x8] sm:$0xf]  ;;  %v513_v25 = vld [vmem:[%s1571_s0] sm:$0xf0]  ;;  %p1017_p1 = scmp.lt.s32.totalorder %s916_s18, %s916_s18 }
   0x7   :  { %50 = vperm.xlu0 %932, %v24_v0   ;;  %78 = vperm.xlu1 %934, %v23_v1   ;;  %v55_v20 = vsub.s32 0, %v54_v17  ;;  %v517_v22 = vsub.s32 4, %v54_v17  ;;  %v87_v23 = vsub.s32 1, %v54_v17  ;;  %v533_v26 = vsub.s32 5, %v54_v17  ;;  %v514_v30 = vld [vmem:[%s1571_s0 + $0x8] sm:$0xf0] }
   0x8   :  { %v127_v27 = vsub.s32 2, %v54_v17  ;;  %v557_v31 = vsub.s32 6, %v54_v17  ;;  %v167_v33 = vsub.s32 3, %v54_v17  ;;  %v581_v45 = vsub.s32 7, %v54_v17 }
   0x9   :  { %v1111_v32 = vrot.slane %v31_v21, %v55_v20  ;;  %v1113_v34 = vrot.slane %v32_v24, %v55_v20  ;;  %v1115_v35 = vrot.slane %v513_v25, %v517_v22  ;;  %v1117_v36 = vrot.slane %v31_v21, %v87_v23 }
   0xa   :  { %v1119_v37 = vrot.slane %v32_v24, %v87_v23  ;;  %v1121_v38 = vrot.slane %v514_v30, %v517_v22  ;;  %v1123_v39 = vrot.slane %v513_v25, %v533_v26  ;;  %v1125_v40 = vrot.slane %v514_v30, %v533_v26 }
   0xb   :  { %935 = vset.pattern.permute.xlu1 %v1036_v5  ;;  %40 = vperm.xlu0 %932, %v22_v4   ;;  %v1127_v41 = vrot.slane %v31_v21, %v127_v27  ;;  %v1129_v42 = vrot.slane %v32_v24, %v127_v27  ;;  %v1131_v43 = vrot.slane %v513_v25, %v557_v31 }
   0xc   :  { %122 = vperm.xlu1 %935, %v24_v0   ;;  %v1133_v44 = vrot.slane %v514_v30, %v557_v31  ;;  %v1137_v50 = vrot.slane %v31_v21, %v167_v33  ;;  %v1139_v51 = vrot.slane %v32_v24, %v167_v33 }
   0xf   :  { %940 = vset.pattern.permute.xlu0 %v1036_v5 }
  0x10   :  { %936 = vset.pattern.permute.xlu1 %v1034_v2  ;;  %114 = vperm.xlu0 %940, %v22_v4  }
  0x11   :  { %74 = vperm.xlu1 %936, %v22_v4  }
  0x14   :  { %941 = vset.pattern.permute.xlu0 %v1037_v6 }
  0x15   :  { %937 = vset.pattern.permute.xlu1 %v1036_v5  ;;  %162 = vperm.xlu0 %941, %v24_v0  }
  0x16   :  { %118 = vperm.xlu1 %937, %v23_v1  }
  0x19   :  { %154 = vperm.xlu0 %941, %v22_v4  }
  0x1a   :  { %938 = vset.pattern.permute.xlu1 %v1035_v3 }
  0x1b   :  { %35 = vperm.xlu1 %938, %v21_v7  }
  0x1d   :  { %946 = vset.pattern.permute.xlu0 %v1035_v3 }
  0x1e   :  { %201 = vperm.xlu0 %946, %v27_v8  }
  0x1f   :  { %939 = vset.pattern.permute.xlu1 %v1034_v2  ;;  %v1155_v2 = vrot.slane %v513_v25, %v581_v45 }
  0x20   :  { %70 = vperm.xlu1 %939, %v21_v7  }
  0x22   :  { %435 = vperm.xlu0 %946, %v30_v9  }
  0x24   :  { %942 = vset.pattern.permute.xlu1 %v1037_v6 }
  0x25   :  { %158 = vperm.xlu1 %942, %v23_v1  }
  0x29   :  { %943 = vset.pattern.permute.xlu1 %v1036_v5 }
  0x2a   :  { %110 = vperm.xlu1 %943, %v21_v7  }
  0x2e   :  { %944 = vset.pattern.permute.xlu1 %v1035_v3 }
  0x2f   :  { %206 = vperm.xlu1 %944, %v28_v10  }
  0x33   :  { %945 = vset.pattern.permute.xlu1 %v1037_v6 }
  0x34   :  { %150 = vperm.xlu1 %945, %v21_v7  }
  0x38   :  { %947 = vset.pattern.permute.xlu1 %v1035_v3  ;;  %v1157_v3 = vrot.slane %v514_v30, %v581_v45 }
  0x39   :  { %196 = vperm.xlu1 %947, %v26_v11  }
  0x3d   :  { %191 = vperm.xlu1 %947, %v25_v12  }
  0x7d   :  { %v46_v13 = vpop.permute.xlu1 %45  ;;  %v83_v14 = vpop.permute.xlu0 %82 }
  0x7e   :  { %v99_v47 = vmul.f32 %v1117_v36, %v83_v14  ;;  %v100_v48 = vmul.f32 %v1119_v37, %v83_v14  ;;  %v545_v52 = vmul.f32 %v1123_v39, %v83_v14  ;;  %v65_v60 = vmul.f32 %v1111_v32, %v46_v13 }
  0x7f   :  { %v66_v61 = vmul.f32 %v1113_v34, %v46_v13  ;;  %v546_v62 = vmul.f32 %v1125_v40, %v83_v14  ;;  %v527_v0 = vmul.f32 %v1115_v35, %v46_v13  ;;  %v528_v1 = vmul.f32 %v1121_v38, %v46_v13 }
  0x82   :  { %v79_v16 = vpop.permute.xlu1 %78  ;;  %v51_v18 = vpop.permute.xlu0 %50 }
  0x83   :  { %v97_v53 = vmul.f32 %v1117_v36, %v79_v16  ;;  %v98_v54 = vmul.f32 %v1119_v37, %v79_v16  ;;  %v67_v55 = vmul.f32 %v1111_v32, %v51_v18  ;;  %v543_v56 = vmul.f32 %v1123_v39, %v79_v16 }
  0x84   :  { %v544_v57 = vmul.f32 %v1125_v40, %v79_v16  ;;  %v68_v58 = vmul.f32 %v1113_v34, %v51_v18  ;;  %v529_v59 = vmul.f32 %v1115_v35, %v51_v18  ;;  %v530_v63 = vmul.f32 %v1121_v38, %v51_v18 }
  0x85   :  { %v105_v5 = vadd.f32 %v97_v53, %v65_v60  ;;  %v106_v6 = vadd.f32 %v98_v54, %v66_v61  ;;  %v107_v7 = vadd.f32 %v99_v47, %v67_v55  ;;  %v551_v9 = vadd.f32 %v543_v56, %v527_v0 }
  0x86   :  { %v41_v28 = vpop.permute.xlu0 %40  ;;  %v552_v10 = vadd.f32 %v544_v57, %v528_v1  ;;  %v108_v11 = vadd.f32 %v100_v48, %v68_v58  ;;  %v553_v12 = vadd.f32 %v545_v52, %v529_v59  ;;  %v554_v15 = vadd.f32 %v546_v62, %v530_v63 }
  0x87   :  { %v123_v19 = vpop.permute.xlu1 %122  ;;  %v63_v18 = vmul.f32 %v1111_v32, %v41_v28  ;;  %v64_v20 = vmul.f32 %v1113_v34, %v41_v28  ;;  %v525_v21 = vmul.f32 %v1115_v35, %v41_v28  ;;  %v526_v22 = vmul.f32 %v1121_v38, %v41_v28 }
  0x88   :  { %v139_v8 = vmul.f32 %v1127_v41, %v123_v19  ;;  %v140_v16 = vmul.f32 %v1129_v42, %v123_v19  ;;  %v569_v13 = vmul.f32 %v1131_v43, %v123_v19  ;;  %v570_v17 = vmul.f32 %v1133_v44, %v123_v19 }
  0x89   :  { %v1038_v56 = vmov 0.0  }
  0x8a   :  { %v147_v23 = vadd.f32 %v139_v8, %v107_v7  ;;  %v148_v33 = vadd.f32 %v140_v16, %v108_v11  ;;  %v577_v45 = vadd.f32 %v569_v13, %v553_v12  ;;  %v578_v47 = vadd.f32 %v570_v17, %v554_v15  ;;  %506 = vmatprep.mubr.f32.mxu0 %v1038_v56 }
  0x8b   :  { %v115_v49 = vpop.permute.xlu0 %114  ;;  %891 = vmatprep.mubr.f32.mxu1 %v1038_v56 }
  0x8c   :  { %v1106_v29 = vpop.permute.xlu1 %74  ;;  %v135_v52 = vmul.f32 %v1127_v41, %v115_v49  ;;  %v136_v53 = vmul.f32 %v1129_v42, %v115_v49  ;;  %v565_v54 = vmul.f32 %v1131_v43, %v115_v49 }
  0x8d   :  { %v95_v24 = vmul.f32 %v1117_v36, %v1106_v29  ;;  %v96_v25 = vmul.f32 %v1119_v37, %v1106_v29  ;;  %v541_v26 = vmul.f32 %v1123_v39, %v1106_v29  ;;  %v542_v48 = vmul.f32 %v1125_v40, %v1106_v29 }
  0x8f   :  { %v103_v57 = vadd.f32 %v95_v24, %v63_v18  ;;  %v104_v58 = vadd.f32 %v96_v25, %v64_v20  ;;  %v549_v59 = vadd.f32 %v541_v26, %v525_v21  ;;  %v550_v11 = vadd.f32 %v542_v48, %v526_v22 }
  0x90   :  { %v163_v14 = vpop.permute.xlu0 %162 }
  0x91   :  { %v119_v46 = vpop.permute.xlu1 %118  ;;  %v179_v12 = vmul.f32 %v1137_v50, %v163_v14  ;;  %v180_v15 = vmul.f32 %v1139_v51, %v163_v14  ;;  %v143_v13 = vadd.f32 %v135_v52, %v103_v57  ;;  %v144_v17 = vadd.f32 %v136_v53, %v104_v58 }
  0x92   :  { %v137_v19 = vmul.f32 %v1127_v41, %v119_v46  ;;  %v138_v30 = vmul.f32 %v1129_v42, %v119_v46  ;;  %v567_v31 = vmul.f32 %v1131_v43, %v119_v46  ;;  %v568_v28 = vmul.f32 %v1133_v44, %v119_v46 }
  0x93   :  { %v566_v46 = vmul.f32 %v1133_v44, %v115_v49  ;;  %v594_v49 = vmul.f32 %v1157_v3, %v163_v14  ;;  %v573_v18 = vadd.f32 %v565_v54, %v549_v59  ;;  %v593_v20 = vmul.f32 %v1155_v2, %v163_v14 }
  0x94   :  { %v155_v55 = vpop.permute.xlu0 %154  ;;  %v145_v60 = vadd.f32 %v137_v19, %v105_v5  ;;  %v146_v61 = vadd.f32 %v138_v30, %v106_v6  ;;  %v575_v62 = vadd.f32 %v567_v31, %v551_v9  ;;  %v576_v63 = vadd.f32 %v568_v28, %v552_v10 }
  0x95   :  { %v574_v19 = vadd.f32 %v566_v46, %v550_v11  ;;  %v188_v30 = vadd.f32 %v180_v15, %v148_v33  ;;  %v1201_v31 = vadd.f32 %v594_v49, %v578_v47  ;;  %v1203_v28 = vadd.f32 %v179_v12, %v147_v23 }
  0x96   :  { %v1159_v4 = vpop.permute.xlu1 %35  ;;  %v175_v48 = vmul.f32 %v1137_v50, %v155_v55  ;;  %v176_v54 = vmul.f32 %v1139_v51, %v155_v55  ;;  %v589_v56 = vmul.f32 %v1155_v2, %v155_v55  ;;  %v1219_v47 = vadd.f32 %v593_v20, %v577_v45 }
  0x97   :  { %v590_v23 = vmul.f32 %v1157_v3, %v155_v55  ;;  %v61_v57 = vmul.f32 %v1111_v32, %v1159_v4  ;;  %v62_v46 = vmul.f32 %v1113_v34, %v1159_v4  ;;  %v524_v32 = vmul.f32 %v1121_v38, %v1159_v4 }
  0x99   :  { %v202_v5 = vpop.permute.xlu0 %201 }
  0x9b   :  { %v1175_v27 = vpop.permute.xlu1 %70 }
  0x9c   :  { %v93_v58 = vmul.f32 %v1117_v36, %v1175_v27  ;;  %v94_v45 = vmul.f32 %v1119_v37, %v1175_v27  ;;  %v539_v36 = vmul.f32 %v1123_v39, %v1175_v27  ;;  %v540_v37 = vmul.f32 %v1125_v40, %v1175_v27 }
  0x9e   :  { %v102_v11 = vadd.f32 %v94_v45, %v62_v46  ;;  %v548_v40 = vadd.f32 %v540_v37, %v524_v32 }
  0xa0   :  { %v159_v29 = vpop.permute.xlu1 %158 }
  0xa1   :  { %v177_v0 = vmul.f32 %v1137_v50, %v159_v29  ;;  %v178_v1 = vmul.f32 %v1139_v51, %v159_v29  ;;  %v591_v7 = vmul.f32 %v1155_v2, %v159_v29  ;;  %v592_v8 = vmul.f32 %v1157_v3, %v159_v29 }
  0xa3   :  { %v185_v6 = vadd.f32 %v177_v0, %v145_v60  ;;  %v186_v9 = vadd.f32 %v178_v1, %v146_v61  ;;  %v599_v10 = vadd.f32 %v591_v7, %v575_v62  ;;  %v600_v16 = vadd.f32 %v592_v8, %v576_v63 }
  0xa4   :  { %v523_v60 = vmul.f32 %v1115_v35, %v1159_v4  ;;  %v183_v63 = vadd.f32 %v175_v48, %v143_v13  ;;  %v184_v35 = vadd.f32 %v176_v54, %v144_v17  ;;  %v597_v0 = vadd.f32 %v589_v56, %v573_v18 }
  0xa5   :  { %v1195_v21 = vadd.f32 %v202_v5, %v185_v6  ;;  %v214_v24 = vadd.f32 %v202_v5, %v186_v9  ;;  %v1197_v22 = vadd.f32 %v599_v10, %v202_v5  ;;  %v1199_v25 = vadd.f32 %v600_v16, %v202_v5  ;;  %v111_v26 = vpop.permute.xlu1 %110 }
  0xa6   :  { %v101_v1 = vadd.f32 %v93_v58, %v61_v57  ;;  %v133_v8 = vmul.f32 %v1127_v41, %v111_v26  ;;  %v134_v4 = vmul.f32 %v1129_v42, %v111_v26  ;;  %v563_v39 = vmul.f32 %v1131_v43, %v111_v26 }
  0xa7   :  { %v1207_v52 = vmul.f32 0.70710677, %v1195_v21  ;;  %v1209_v14 = vmul.f32 0.70710677, %v214_v24  ;;  %v1212_v53 = vmul.f32 0.70710677, %v1197_v22  ;;  %v547_v12 = vadd.f32 %v539_v36, %v523_v60 }
  0xa8   :  { %v1217_v33 = vmul.f32 0.70710677, %v1199_v25  ;;  %v564_v5 = vmul.f32 %v1133_v44, %v111_v26  ;;  %v598_v17 = vadd.f32 %v590_v23, %v574_v19  ;;  %v141_v41 = vadd.f32 %v133_v8, %v101_v1 }
  0xa9   :  { %v237_v59 = vand.u32 2147483647, %v1207_v52  ;;  %v238_v61 = vand.u32 2147483647, %v1209_v14  ;;  %v631_v62 = vand.u32 2147483647, %v1212_v53  ;;  %v142_v20 = vadd.f32 %v134_v4, %v102_v11 }
  0xaa   :  { %v1234_v55 = vpop.permute.xlu1 %206  ;;  %v632_v29 = vand.u32 2147483647, %v1217_v33  ;;  %v571_v48 = vadd.f32 %v563_v39, %v547_v12  ;;  %v572_v56 = vadd.f32 %v564_v5, %v548_v40  ;;  %v1251_v57 = vmul.f32 0.5, %v214_v24 }
  0xab   :  { %v245_v34 = vmul.f32 0.3275911, %v237_v59  ;;  %v349_v7 = vmul.f32 %v237_v59, %v237_v59  ;;  %v350_v38 = vmul.f32 %v238_v61, %v238_v61  ;;  %v246_v15 = vmul.f32 0.3275911, %v238_v61 }
  0xac   :  { %v639_v49 = vmul.f32 0.3275911, %v631_v62  ;;  %v640_v10 = vmul.f32 0.3275911, %v632_v29  ;;  %v743_v16 = vmul.f32 %v631_v62, %v631_v62  ;;  %v744_v13 = vmul.f32 %v632_v29, %v632_v29 }
  0xad   :  { %v253_v9 = vadd.f32 1.0, %v245_v34  ;;  %v357_v27 = vsub.f32 0.0, %v349_v7  ;;  %v358_v18 = vsub.f32 0.0, %v350_v38  ;;  %v1249_v42 = vadd.f32 %v1234_v55, %v188_v30 }
  0xae   :  { %v254_v43 = vadd.f32 1.0, %v246_v15  ;;  %v647_v54 = vadd.f32 1.0, %v639_v49  ;;  %v648_v44 = vadd.f32 1.0, %v640_v10  ;;  %v751_v26 = vsub.f32 0.0, %v743_v16 }
  0xaf   :  { %v151_v6 = vpop.permute.xlu1 %150  ;;  %948 = vrcp.f32 %v253_v9  ;;  %v752_v58 = vsub.f32 0.0, %v744_v13  ;;  %v369_v46 = vmul.f32 1.442695, %v357_v27  ;;  %v371_v45 = vmul.f32 1.442695, %v358_v18 }
  0xb0   :  { %v173_v30 = vmul.f32 %v1137_v50, %v151_v6  ;;  %v1263_v24 = vmul.f32 0.70710677, %v1249_v42  ;;  %v174_v32 = vmul.f32 %v1139_v51, %v151_v6  ;;  %950 = vrcp.f32 %v254_v43 }
  0xb1   :  { %v587_v34 = vmul.f32 %v1155_v2, %v151_v6  ;;  %v588_v50 = vmul.f32 %v1157_v3, %v151_v6  ;;  %952 = vpow2.f32 %v369_v46  ;;  %v765_v1 = vmul.f32 1.442695, %v752_v58 }
  0xb2   :  { %954 = vpow2.f32 %v371_v45  ;;  %v181_v7 = vadd.f32 %v173_v30, %v141_v41  ;;  %v182_v2 = vadd.f32 %v174_v32, %v142_v20  ;;  %v240_v3 = vand.u32 2147483647, %v1263_v24 }
  0xb3   :  { %956 = vrcp.f32 %v647_v54  ;;  %v595_v39 = vadd.f32 %v587_v34, %v571_v48  ;;  %v596_v12 = vadd.f32 %v588_v50, %v572_v56  ;;  %v1295_v27 = vadd.f32 %v1201_v31, %v1234_v55 }
  0xb4   :  { %v197_v59 = vpop.permute.xlu1 %196  ;;  %958 = vrcp.f32 %v648_v44  ;;  %v248_v40 = vmul.f32 0.3275911, %v240_v3  ;;  %v1313_v30 = vmul.f32 %v240_v3, %v240_v3  ;;  %vm398_vm0 = vcmp.lt.f32.partialorder %v1209_v14, 0.0 }
  0xb5   :  { %v1253_v60 = vadd.f32 %v197_v59, %v183_v63  ;;  %v1255_v19 = vadd.f32 %v197_v59, %v184_v35  ;;  %v1257_v23 = vadd.f32 %v597_v0, %v197_v59  ;;  %v1260_v61 = vadd.f32 %v598_v17, %v197_v59 }
  0xb6   :  { %v763_v35 = vmul.f32 1.442695, %v751_v26  ;;  %vm792_vm1 = vcmp.lt.f32.partialorder %v1217_v33, 0.0  ;;  %vm397_vm2 = vcmp.lt.f32.partialorder %v1207_v52, 0.0  ;;  %vm791_vm3 = vcmp.lt.f32.partialorder %v1212_v53, 0.0 }
  0xb7   :  { %1590 = vst [vmem:[#allocation5_spill] sm:$0xff] %v1253_v60  ;;  %1591 = vst [vmem:[#allocation6_spill] sm:$0xff] %v1257_v23  ;;  %v1267_v36 = vmul.f32 0.70710677, %v1253_v60  ;;  %v1270_v62 = vmul.f32 0.70710677, %v1255_v19 }
  0xb8   :  { %1592 = vst [vmem:[#allocation7_spill] sm:$0xff] %v1260_v61  ;;  %v1273_v63 = vmul.f32 0.70710677, %v1257_v23  ;;  %v1278_v29 = vmul.f32 0.70710677, %v1260_v61  ;;  %v192_v8 = vpop.permute.xlu1 %191  ;;  %960 = vpow2.f32 %v763_v35  ;;  %v1318_v35 = vadd.f32 %v1234_v55, %v1203_v28 }
  0xb9   :  { %1593 = vst [vmem:[#allocation8_spill] sm:$0xff] %v1267_v36  ;;  %v235_v51 = vand.u32 2147483647, %v1267_v36  ;;  %v236_v0 = vand.u32 2147483647, %v1270_v62  ;;  %v1285_v49 = vadd.f32 %v192_v8, %v181_v7  ;;  %v1287_v5 = vadd.f32 %v192_v8, %v182_v2 }
  0xba   :  { %1594 = vst [vmem:[#allocation9_spill] sm:$0xff] %v1273_v63  ;;  %v629_v37 = vand.u32 2147483647, %v1273_v63  ;;  %v630_v4 = vand.u32 2147483647, %v1278_v29  ;;  %v1289_v16 = vadd.f32 %v595_v39, %v192_v8  ;;  %v1291_v13 = vadd.f32 %v596_v12, %v192_v8 }
  0xbb   :  { %v347_v11 = vmul.f32 %v235_v51, %v235_v51  ;;  %v348_v38 = vmul.f32 %v236_v0, %v236_v0  ;;  %v243_v15 = vmul.f32 0.3275911, %v235_v51  ;;  %1595 = vst [vmem:[#allocation10_spill] sm:$0xff] %v1285_v49  ;;  %1596 = vst [vmem:[#allocation11_spill] sm:$0xff] %v1287_v5  ;;  %v244_v6 = vmul.f32 0.3275911, %v236_v0 }
  0xbc   :  { %v741_v10 = vmul.f32 %v629_v37, %v629_v37  ;;  %1597 = vst [vmem:[#allocation12_spill] sm:$0xff] %v1289_v16  ;;  %1598 = vst [vmem:[#allocation13_spill] sm:$0xff] %v1291_v13  ;;  %v637_v41 = vmul.f32 0.3275911, %v629_v37  ;;  %v638_v18 = vmul.f32 0.3275911, %v630_v4  ;;  %v742_v20 = vmul.f32 %v630_v4, %v630_v4  ;;  %v1297_v48 = vpop.eup %948 }
  0xbd   :  { %v355_v9 = vsub.f32 0.0, %v347_v11  ;;  %v356_v17 = vsub.f32 0.0, %v348_v38  ;;  %962 = vpow2.f32 %v765_v1  ;;  %v251_v43 = vadd.f32 1.0, %v243_v15  ;;  %v1320_v51 = vpop.eup %950 }
  0xbe   :  { %v1300_v54 = vmul.f32 0.70710677, %v1285_v49  ;;  %v1303_v56 = vmul.f32 0.70710677, %v1287_v5  ;;  %v252_v44 = vadd.f32 1.0, %v244_v6  ;;  %v749_v58 = vsub.f32 0.0, %v741_v10  ;;  %v1322_v7 = vpop.eup %952 }
  0xbf   :  { %v365_v26 = vmul.f32 1.442695, %v355_v9  ;;  %v1306_v31 = vmul.f32 0.70710677, %v1289_v16  ;;  %v1311_v45 = vmul.f32 0.70710677, %v1291_v13  ;;  %964 = vrcp.f32 %v251_v43  ;;  %v1324_v3 = vpop.eup %954 }
  0xc0   :  { %1599 = vst [vmem:[#allocation14_spill] sm:$0xff] %v1300_v54  ;;  %1600 = vst [vmem:[#allocation15_spill] sm:$0xff] %v1303_v56  ;;  %v233_v59 = vand.u32 2147483647, %v1300_v54  ;;  %v234_v46 = vand.u32 2147483647, %v1303_v56  ;;  %966 = vrcp.f32 %v252_v44  ;;  %v1327_v39 = vpop.eup %956 }
  0xc1   :  { %1601 = vst [vmem:[#allocation16_spill] sm:$0xff] %v1306_v31  ;;  %1602 = vst [vmem:[#allocation17_spill] sm:$0xff] %v1311_v45  ;;  %v367_v32 = vmul.f32 1.442695, %v356_v17  ;;  %v750_v34 = vsub.f32 0.0, %v742_v20  ;;  %v645_v0 = vadd.f32 1.0, %v637_v41  ;;  %968 = vpow2.f32 %v365_v26  ;;  %v1332_v41 = vpop.eup %958 }
  0xc2   :  { %v627_v50 = vand.u32 2147483647, %v1306_v31  ;;  %v241_v1 = vmul.f32 0.3275911, %v233_v59  ;;  %v345_v37 = vmul.f32 %v233_v59, %v233_v59  ;;  %v646_v8 = vadd.f32 1.0, %v638_v18 }
  0xc3   :  { %v242_v11 = vmul.f32 0.3275911, %v234_v46  ;;  %v346_v2 = vmul.f32 %v234_v46, %v234_v46  ;;  %v759_v38 = vmul.f32 1.442695, %v749_v58  ;;  %v628_v28 = vand.u32 2147483647, %v1311_v45 }
  0xc4   :  { %v353_v4 = vsub.f32 0.0, %v345_v37  ;;  %970 = vpow2.f32 %v367_v32  ;;  %v761_v12 = vmul.f32 1.442695, %v750_v34  ;;  %v635_v6 = vmul.f32 0.3275911, %v627_v50 }
  0xc5   :  { %v354_v15 = vsub.f32 0.0, %v346_v2  ;;  %972 = vrcp.f32 %v645_v0  ;;  %v249_v9 = vadd.f32 1.0, %v241_v1  ;;  %v256_v10 = vadd.f32 1.0, %v248_v40  ;;  %v1338_v59 = vpop.eup %960 }
  0xc6   :  { %v1330_v17 = vmul.f32 0.5, %v1199_v25  ;;  %974 = vrcp.f32 %v646_v8  ;;  %v250_v18 = vadd.f32 1.0, %v242_v11  ;;  %v739_v20 = vmul.f32 %v627_v50, %v627_v50 }
  0xc7   :  { %v360_v43 = vsub.f32 0.0, %v1313_v30  ;;  %976 = vpow2.f32 %v759_v38  ;;  %v361_v44 = vmul.f32 1.442695, %v353_v4  ;;  %v636_v26 = vmul.f32 0.3275911, %v628_v28 }
  0xc8   :  { %v1336_v58 = vmul.f32 0.70710677, %v1295_v27  ;;  %978 = vpow2.f32 %v761_v12  ;;  %v363_v40 = vmul.f32 1.442695, %v354_v15  ;;  %v643_v46 = vadd.f32 1.0, %v635_v6 }
  0xc9   :  { %v1341_v25 = vmul.f32 0.70710677, %v1318_v35  ;;  %980 = vrcp.f32 %v249_v9  ;;  %v740_v32 = vmul.f32 %v628_v28, %v628_v28  ;;  %v609_v30 = vadd.f32 %v1219_v47, %v1234_v55 }
  0xca   :  { %v634_v34 = vand.u32 2147483647, %v1336_v58  ;;  %v1346_v50 = vpop.eup %962  ;;  %982 = vrcp.f32 %v250_v18  ;;  %v747_v0 = vsub.f32 0.0, %v739_v20  ;;  %v278_v37 = vmul.f32 1.0614054, %v1320_v51 }
  0xcb   :  { %v239_v1 = vand.u32 2147483647, %v1341_v25  ;;  %984 = vpow2.f32 %v361_v44  ;;  %v644_v8 = vadd.f32 1.0, %v636_v26  ;;  %v1350_v28 = vmul.f32 0.70710677, %v609_v30 }
  0xcc   :  { %v642_v11 = vmul.f32 0.3275911, %v634_v34  ;;  %v746_v2 = vmul.f32 %v634_v34, %v634_v34  ;;  %986 = vpow2.f32 %v363_v40  ;;  %v748_v12 = vsub.f32 0.0, %v740_v32  ;;  %v1352_v15 = vpop.eup %964 }
  0xcd   :  { %v247_v38 = vmul.f32 0.3275911, %v239_v1  ;;  %v351_v4 = vmul.f32 %v239_v1, %v239_v1  ;;  %988 = vrcp.f32 %v256_v10  ;;  %v286_v55 = vadd.f32 -1.4531521, %v278_v37  ;;  %v1355_v20 = vpop.eup %966 }
  0xce   :  { %v650_v47 = vadd.f32 1.0, %v642_v11  ;;  %990 = vrcp.f32 %v643_v46  ;;  %v755_v6 = vmul.f32 1.442695, %v747_v0  ;;  %v633_v18 = vand.u32 2147483647, %v1350_v28  ;;  %v1361_v32 = vpop.eup %968 }
  0xcf   :  { %v255_v9 = vadd.f32 1.0, %v247_v38  ;;  %v1358_v44 = vmul.f32 0.5, %v1249_v42  ;;  %v754_v26 = vsub.f32 0.0, %v746_v2  ;;  %v294_v40 = vmul.f32 %v1320_v51, %v286_v55  ;;  %1603 = vst [vmem:[#allocation18_spill] sm:$0xff] %v1361_v32 }
  0xd0   :  { %992 = vrcp.f32 %v650_v47  ;;  %v1364_v10 = vmul.f32 0.5, %v1295_v27  ;;  %v359_v46 = vsub.f32 0.0, %v351_v4  ;;  %v641_v34 = vmul.f32 0.3275911, %v633_v18 }
  0xd1   :  { %994 = vrcp.f32 %v255_v9  ;;  %v1366_v0 = vpop.eup %970  ;;  %v375_v1 = vmul.f32 1.442695, %v360_v43  ;;  %v302_v37 = vadd.f32 1.4214138, %v294_v40  ;;  %v672_v42 = vmul.f32 1.0614054, %v1332_v41 }
  0xd2   :  { %996 = vrcp.f32 %v644_v8  ;;  %v1369_v11 = vpop.eup %972  ;;  %v1371_v2 = vmul.f32 1.442695, %v748_v12  ;;  %v649_v38 = vadd.f32 1.0, %v641_v34  ;;  %v745_v47 = vmul.f32 %v633_v18, %v633_v18 }
  0xd3   :  { %998 = vpow2.f32 %v755_v6  ;;  %v1373_v55 = vpop.eup %974  ;;  %v769_v27 = vmul.f32 1.442695, %v754_v26  ;;  %v310_v4 = vmul.f32 %v1320_v51, %v302_v37  ;;  %v680_v9 = vadd.f32 -1.4531521, %v672_v42 }
  0xd4   :  { %v277_v16 = vmul.f32 1.0614054, %v1297_v48  ;;  %v1377_v8 = vpop.eup %976  ;;  %v1380_v43 = vmul.f32 0.5, %v1318_v35  ;;  %v373_v40 = vmul.f32 1.442695, %v359_v46  ;;  %1000 = vrcp.f32 %v649_v38 }
  0xd5   :  { %1604 = vst [vmem:[#allocation19_spill] sm:$0xff] %v1377_v8  ;;  %v671_v12 = vmul.f32 1.0614054, %v1327_v39  ;;  %v1383_v6 = vpop.eup %978  ;;  %v1385_v18 = vmul.f32 0.5, %v609_v30  ;;  %v318_v34 = vadd.f32 -0.28449672, %v310_v4  ;;  %v688_v26 = vmul.f32 %v1332_v41, %v680_v9 }
  0xd6   :  { %v285_v37 = vadd.f32 -1.4531521, %v277_v16  ;;  %v1388_v42 = vpop.eup %980  ;;  %1002 = vpow2.f32 %v375_v1  ;;  %v753_v49 = vsub.f32 0.0, %v745_v47  ;;  %v276_v35 = vmul.f32 1.0614054, %v1355_v20 }
  0xd7   :  { %v679_v31 = vadd.f32 -1.4531521, %v671_v12  ;;  %v1391_v13 = vpop.eup %982  ;;  %1004 = vpow2.f32 %v769_v27  ;;  %v326_v46 = vmul.f32 %v1320_v51, %v318_v34  ;;  %v696_v38 = vadd.f32 1.4214138, %v688_v26 }
  0xd8   :  { %v293_v30 = vmul.f32 %v1297_v48, %v285_v37  ;;  %v1395_v45 = vpop.eup %984  ;;  %1006 = vpow2.f32 %v373_v40  ;;  %v284_v4 = vadd.f32 -1.4531521, %v276_v35  ;;  %v670_v1 = vmul.f32 1.0614054, %v1373_v55 }
  0xd9   :  { %1605 = vst [vmem:[#allocation20_spill] sm:$0xff] %v1395_v45  ;;  %v687_v16 = vmul.f32 %v1327_v39, %v679_v31  ;;  %v1399_v47 = vpop.eup %986  ;;  %v334_v9 = vadd.f32 0.2548296, %v326_v46  ;;  %v704_v12 = vmul.f32 %v1332_v41, %v696_v38  ;;  %v1403_v27 = vmul.f32 0.5, %v1195_v21 }
  0xda   :  { %1606 = vst [vmem:[#allocation21_spill] sm:$0xff] %v1399_v47  ;;  %v301_v34 = vadd.f32 1.4214138, %v293_v30  ;;  %v1405_v26 = vpop.eup %988  ;;  %v767_v37 = vmul.f32 1.442695, %v753_v49  ;;  %v1408_v54 = vmul.f32 0.5, %v1197_v22  ;;  %v292_v31 = vmul.f32 %v1355_v20, %v284_v4 }
  0xdb   :  { %v695_v40 = vadd.f32 1.4214138, %v687_v16  ;;  %v1411_v35 = vpop.eup %990  ;;  %v280_v23 = vmul.f32 1.0614054, %v1405_v26  ;;  %v342_v46 = vmul.f32 %v1320_v51, %v334_v9  ;;  %v712_v38 = vadd.f32 -0.28449672, %v704_v12 }
  0xdc   :  { %v309_v21 = vmul.f32 %v1297_v48, %v301_v34  ;;  %v1420_v49 = vmul.f32 0.5, %v1255_v19  ;;  %v300_v22 = vadd.f32 1.4214138, %v292_v31  ;;  %v678_v16 = vadd.f32 -1.4531521, %v670_v1 }
  0xdd   :  { %v1416_v56 = vpop.eup %992  ;;  %v703_v30 = vmul.f32 %v1327_v39, %v695_v40  ;;  %v288_v4 = vadd.f32 -1.4531521, %v280_v23  ;;  %v382_v45 = vmul.f32 %v1324_v3, %v342_v46  ;;  %v720_v51 = vmul.f32 %v1332_v41, %v712_v38 }
  0xde   :  { %v1422_v63 = vpop.eup %994  ;;  %v674_v5 = vmul.f32 1.0614054, %v1416_v56  ;;  %1008 = vpow2.f32 %v767_v37  ;;  %v317_v19 = vadd.f32 -0.28449672, %v309_v21  ;;  %v308_v38 = vmul.f32 %v1355_v20, %v300_v22 }
  0xdf   :  { %v1428_v9 = vpop.eup %996  ;;  %v279_v12 = vmul.f32 1.0614054, %v1422_v63  ;;  %v711_v34 = vadd.f32 -0.28449672, %v703_v30  ;;  %v296_v1 = vmul.f32 %v1405_v26, %v288_v4  ;;  %v390_v31 = vsub.f32 1.0, %v382_v45 }
  0xe0   :  { %v1431_v40 = vpop.eup %998  ;;  %v682_v23 = vadd.f32 -1.4531521, %v674_v5  ;;  %v728_v47 = vadd.f32 0.2548296, %v720_v51  ;;  %v325_v3 = vmul.f32 %v1297_v48, %v317_v19  ;;  %v686_v36 = vmul.f32 %v1373_v55, %v678_v16 }
  0xe1   :  { %1607 = vst [vmem:[#allocation22_spill] sm:$0xff] %v1431_v40  ;;  %v287_v8 = vadd.f32 -1.4531521, %v279_v12  ;;  %v719_v46 = vmul.f32 %v1327_v39, %v711_v34  ;;  %v1438_v60 = vpop.eup %1000  ;;  %v304_v37 = vadd.f32 1.4214138, %v296_v1  ;;  %v406_v30 = vsub.f32 0.0, %v390_v31 }
  0xe2   :  { %v690_v21 = vmul.f32 %v1416_v56, %v682_v23  ;;  %v736_v4 = vmul.f32 %v1332_v41, %v728_v47  ;;  %v673_v45 = vmul.f32 1.0614054, %v1438_v60  ;;  %v333_v51 = vadd.f32 0.2548296, %v325_v3 }
  0xe3   :  { %v295_v5 = vmul.f32 %v1422_v63, %v287_v8  ;;  %v727_v12 = vadd.f32 0.2548296, %v719_v46  ;;  %v1003_v40 = vpop.eup %1002  ;;  %v312_v19 = vmul.f32 %v1405_v26, %v304_v37  ;;  %v316_v41 = vadd.f32 -0.28449672, %v308_v38 }
  0xe4   :  { %v698_v34 = vadd.f32 1.4214138, %v690_v21  ;;  %v776_v22 = vmul.f32 %v1346_v50, %v736_v4  ;;  %v1005_v1 = vpop.eup %1004  ;;  %v681_v23 = vadd.f32 -1.4531521, %v673_v45  ;;  %v341_v61 = vmul.f32 %v1297_v48, %v333_v51 }
  0xe5   :  { %v303_v32 = vadd.f32 1.4214138, %v295_v5  ;;  %v1007_v8 = vpop.eup %1006  ;;  %v320_v47 = vadd.f32 -0.28449672, %v312_v19  ;;  %v735_v37 = vmul.f32 %v1327_v39, %v727_v12  ;;  %v414_v16 = vsel %vm398_vm0, %v406_v30, %v390_v31 }
  0xe6   :  { %v706_v3 = vmul.f32 %v1416_v56, %v698_v34  ;;  %v784_v46 = vsub.f32 1.0, %v776_v22  ;;  %v689_v50 = vmul.f32 %v1438_v60, %v681_v23  ;;  %v381_v4 = vmul.f32 %v1322_v7, %v341_v61 }
  0xe7   :  { %v311_v21 = vmul.f32 %v1422_v63, %v303_v32  ;;  %v328_v48 = vmul.f32 %v1405_v26, %v320_v47  ;;  %v775_v45 = vmul.f32 %v1338_v59, %v735_v37  ;;  %v324_v39 = vmul.f32 %v1355_v20, %v316_v41 }
  0xe8   :  { %v714_v5 = vadd.f32 -0.28449672, %v706_v3  ;;  %v800_v38 = vsub.f32 0.0, %v784_v46  ;;  %v697_v19 = vadd.f32 1.4214138, %v689_v50  ;;  %v389_v34 = vsub.f32 1.0, %v381_v4 }
  0xe9   :  { %v319_v51 = vadd.f32 -0.28449672, %v311_v21  ;;  %v336_v12 = vadd.f32 0.2548296, %v328_v48  ;;  %v422_v22 = vadd.f32 1.0, %v414_v16  ;;  %vm400_vm4 = vcmp.lt.f32.partialorder %v1263_v24, 0.0 }
  0xea   :  { %v722_v32 = vmul.f32 %v1416_v56, %v714_v5  ;;  %v808_v14 = vsel %vm792_vm1, %v800_v38, %v784_v46  ;;  %v705_v7 = vmul.f32 %v1438_v60, %v697_v19  ;;  %v405_v59 = vsub.f32 0.0, %v389_v34 }
  0xeb   :  { %v327_v61 = vmul.f32 %v1422_v63, %v319_v51  ;;  %v783_v31 = vsub.f32 1.0, %v775_v45  ;;  %v1009_v30 = vpop.eup %1008  ;;  %v344_v23 = vmul.f32 %v1405_v26, %v336_v12  ;;  %v816_v47 = vadd.f32 1.0, %v808_v14 }
  0xec   :  { %v730_v41 = vadd.f32 0.2548296, %v722_v32  ;;  %v332_v3 = vadd.f32 0.2548296, %v324_v39  ;;  %1010 = vpow2.f32 %v1371_v2  ;;  %vm794_vm5 = vcmp.lt.f32.partialorder %v1336_v58, 0.0 }
  0xed   :  { %v335_v33 = vadd.f32 0.2548296, %v327_v61  ;;  %v713_v46 = vadd.f32 -0.28449672, %v705_v7  ;;  %v275_v37 = vmul.f32 1.0614054, %v1352_v15  ;;  %v384_v21 = vmul.f32 %v1003_v40, %v344_v23 }
  0xee   :  { %v738_v50 = vmul.f32 %v1416_v56, %v730_v41  ;;  %vm399_vm6 = vcmp.lt.f32.partialorder %v1341_v25, 0.0  ;;  %v1473_v16 = vmul.f32 %v422_v22, %v1251_v57  ;;  %v413_v26 = vsel %vm397_vm2, %v405_v59, %v389_v34 }
  0xef   :  { %v343_v4 = vmul.f32 %v1422_v63, %v335_v33  ;;  %v721_v2 = vmul.f32 %v1438_v60, %v713_v46  ;;  %v799_v48 = vsub.f32 0.0, %v783_v31  ;;  %v340_v5 = vmul.f32 %v1355_v20, %v332_v3 }
  0xf0   :  { %vm396_vm7 = vcmp.lt.f32.partialorder %v1270_v62, 0.0  ;;  %v392_v40 = vsub.f32 1.0, %v384_v21  ;;  %v778_v38 = vmul.f32 %v1005_v1, %v738_v50  ;;  %v1482_v56 = vmul.f32 %v816_v47, %v1330_v17 }
  0xf1   :  { %v694_v45 = vadd.f32 1.4214138, %v686_v36  ;;  %v383_v57 = vmul.f32 %v1007_v8, %v343_v4  ;;  %v729_v51 = vadd.f32 0.2548296, %v721_v2  ;;  %v421_v19 = vadd.f32 1.0, %v413_v26 }
  0xf2   :  { %v380_v52 = vmul.f32 %v1366_v0, %v340_v5  ;;  %v408_v34 = vsub.f32 0.0, %v392_v40  ;;  %v786_v63 = vsub.f32 1.0, %v778_v38  ;;  %vm793_vm8 = vcmp.lt.f32.partialorder %v1350_v28, 0.0 }
  0xf3   :  { %v702_v39 = vmul.f32 %v1373_v55, %v694_v45  ;;  %v283_v20 = vadd.f32 -1.4531521, %v275_v37  ;;  %v391_v12 = vsub.f32 1.0, %v383_v57  ;;  %v737_v32 = vmul.f32 %v1438_v60, %v729_v51 }
  0xf4   :  { %v807_v17 = vsel %vm791_vm3, %v799_v48, %v783_v31  ;;  %v388_v1 = vsub.f32 1.0, %v380_v52  ;;  %v416_v36 = vsel %vm400_vm4, %v408_v34, %v392_v40  ;;  %v802_v8 = vsub.f32 0.0, %v786_v63 }
  0xf5   :  { %v710_v22 = vadd.f32 -0.28449672, %v702_v39  ;;  %v291_v0 = vmul.f32 %v1352_v15, %v283_v20  ;;  %v424_v14 = vadd.f32 1.0, %v416_v36  ;;  %v407_v61 = vsub.f32 0.0, %v391_v12 }
  0xf6   :  { %v777_v7 = vmul.f32 %v1009_v30, %v737_v32  ;;  %v404_v59 = vsub.f32 0.0, %v388_v1  ;;  %v810_v23 = vsel %vm794_vm5, %v802_v8, %v786_v63  ;;  %v815_v41 = vadd.f32 1.0, %v807_v17 }
  0xf7   :  { %v718_v60 = vmul.f32 %v1373_v55, %v710_v22  ;;  %v299_v53 = vadd.f32 1.4214138, %v291_v0  ;;  %v432_v31 = vmul.f32 %v424_v14, %v1358_v44  ;;  %v818_v47 = vadd.f32 1.0, %v810_v23  ;;  %v1608_v22 = vld [vmem:[#allocation7_spill] sm:$0xff]  ;;  %v1609_v14 = vld [vmem:[#allocation18_spill] sm:$0xff] }
  0xf8   :  { %v415_v24 = vsel %vm399_vm6, %v407_v61, %v391_v12  ;;  %v785_v3 = vsub.f32 1.0, %v777_v7  ;;  %v412_v46 = vsel %vm396_vm7, %v404_v59, %v388_v1  ;;  %vm790_vm9 = vcmp.lt.f32.partialorder %v1278_v29, 0.0 }
  0xf9   :  { %v423_v33 = vadd.f32 1.0, %v415_v24  ;;  %v726_v30 = vadd.f32 0.2548296, %v718_v60  ;;  %v307_v37 = vmul.f32 %v1352_v15, %v299_v53  ;;  %466 = vmatprep.subr.mxu0 %v432_v31  ;;  %v826_v58 = vmul.f32 %v818_v47, %v1364_v10  ;;  %v1505_v26 = vpop.eup %1010 }
  0xfa   :  { %v801_v21 = vsub.f32 0.0, %v785_v3  ;;  %v420_v50 = vadd.f32 1.0, %v412_v46  ;;  %v669_v44 = vmul.f32 1.0614054, %v1369_v11  ;;  %v429_v4 = vmul.f32 %v421_v19, %v1403_v27 }
  0xfb   :  { %v431_v25 = vmul.f32 %v423_v33, %v1380_v43  ;;  %v734_v62 = vmul.f32 %v1373_v55, %v726_v30  ;;  %v315_v2 = vadd.f32 -0.28449672, %v307_v37  ;;  %851 = vmatprep.subr.mxu1 %v826_v58  ;;  %v274_v40 = vmul.f32 1.0614054, %v1391_v13  ;;  %v1610_v30 = vld [vmem:[#allocation8_spill] sm:$0xff] }
  0xfc   :  { %v809_v48 = vsel %vm793_vm8, %v801_v21, %v785_v3  ;;  %v428_v10 = vmul.f32 %v420_v50, %v1420_v49  ;;  %v677_v5 = vadd.f32 -1.4531521, %v669_v44  ;;  %v668_v27 = vmul.f32 1.0614054, %v1428_v9  ;;  %v1611_v50 = vld [vmem:[#allocation5_spill] sm:$0xff] }
  0xfd   :  { %467 = vmatpush1.msra.mxu0 %v431_v25  ;;  %v817_v38 = vadd.f32 1.0, %v809_v48  ;;  %v774_v45 = vmul.f32 %v1383_v6, %v734_v62  ;;  %v323_v43 = vmul.f32 %v1352_v15, %v315_v2  ;;  %v282_v57 = vadd.f32 -1.4531521, %v274_v40 }
  0xfe   :  { %468 = vmatprep.subr.mxu0 %v1473_v16  ;;  %v685_v55 = vmul.f32 %v1369_v11, %v677_v5  ;;  %v273_v28 = vmul.f32 1.0614054, %v1388_v42  ;;  %v667_v49 = vmul.f32 1.0614054, %v1411_v35  ;;  %v676_v34 = vadd.f32 -1.4531521, %v668_v27 }
  0xff   :  { %v825_v51 = vmul.f32 %v817_v38, %v1385_v18  ;;  %469 = vmatpush1.msra.mxu0 %v429_v4  ;;  %v782_v19 = vsub.f32 1.0, %v774_v45  ;;  %v331_v52 = vadd.f32 0.2548296, %v323_v43  ;;  %v290_v63 = vmul.f32 %v1391_v13, %v282_v57  ;;  %v1612_v43 = vld [vmem:[#allocation19_spill] sm:$0xff] }
 0x100   :  { %470 = vmatprep.subr.mxu0 %v428_v10  ;;  %v693_v6 = vadd.f32 1.4214138, %v685_v55  ;;  %v281_v39 = vadd.f32 -1.4531521, %v273_v28  ;;  %v675_v20 = vadd.f32 -1.4531521, %v667_v49  ;;  %v823_v16 = vmul.f32 %v815_v41, %v1408_v54 }
 0x101   :  { %852 = vmatpush1.msra.mxu1 %v825_v51  ;;  %v798_v12 = vsub.f32 0.0, %v782_v19  ;;  %v339_v32 = vmul.f32 %v1352_v15, %v331_v52  ;;  %v684_v17 = vmul.f32 %v1428_v9, %v676_v34  ;;  %v298_v1 = vadd.f32 1.4214138, %v290_v63 }
 0x102   :  { %853 = vmatprep.subr.mxu1 %v1482_v56  ;;  %v701_v18 = vmul.f32 %v1369_v11, %v693_v6  ;;  %v289_v36 = vmul.f32 %v1388_v42, %v281_v39  ;;  %v683_v8 = vmul.f32 %v1411_v35, %v675_v20  ;;  %v614_v0 = vmul.f32 0.5, %v1608_v22  ;;  %v1614_v20 = vld [vmem:[#allocation20_spill] sm:$0xff]  ;;  %v1619_v22 = vld [vmem:[#allocation6_spill] sm:$0xff] }
 0x103   :  { %854 = vmatpush1.msra.mxu1 %v823_v16  ;;  %v806_v54 = vsel %vm790_vm9, %v798_v12, %v782_v19  ;;  %v379_v61 = vmul.f32 %v1609_v14, %v339_v32  ;;  %v692_v15 = vadd.f32 1.4214138, %v684_v17  ;;  %v306_v56 = vmul.f32 %v1391_v13, %v298_v1  ;;  %v1613_v19 = vld [vmem:[#allocation21_spill] sm:$0xff]  ;;  %v1615_v12 = vld [vmem:[#allocation11_spill] sm:$0xff]  ;;  %v1617_v17 = vld [vmem:[#allocation22_spill] sm:$0xff] }
 0x104   :  { %v814_v7 = vadd.f32 1.0, %v806_v54  ;;  %v709_v59 = vadd.f32 -0.28449672, %v701_v18  ;;  %v297_v23 = vadd.f32 1.4214138, %v289_v36  ;;  %vm395_vm10 = vcmp.lt.f32.partialorder %v1610_v30, 0.0 }
 0x105   :  { %v387_v41 = vsub.f32 1.0, %v379_v61  ;;  %v700_v60 = vmul.f32 %v1428_v9, %v692_v15  ;;  %v691_v53 = vadd.f32 1.4214138, %v683_v8  ;;  %v314_v24 = vadd.f32 -0.28449672, %v306_v56  ;;  %v1616_v32 = vld [vmem:[#allocation9_spill] sm:$0xff] }
 0x106   :  { %v822_v31 = vmul.f32 %v814_v7, %v614_v0  ;;  %v717_v47 = vmul.f32 %v1369_v11, %v709_v59  ;;  %v305_v3 = vmul.f32 %v1388_v42, %v297_v23  ;;  %v219_v44 = vmul.f32 0.5, %v1611_v50  ;;  %v1618_v1 = vld [vmem:[#allocation15_spill] sm:$0xff]  ;;  %v1620_v14 = vld [vmem:[#allocation14_spill] sm:$0xff]  ;;  %v1621_v61 = vld [vmem:[#allocation17_spill] sm:$0xff] }
 0x107   :  { %v403_v29 = vsub.f32 0.0, %v387_v41  ;;  %v708_v33 = vadd.f32 -0.28449672, %v700_v60  ;;  %v699_v46 = vmul.f32 %v1411_v35, %v691_v53  ;;  %v322_v58 = vmul.f32 %v1391_v13, %v314_v24  ;;  %v1622_v60 = vld [vmem:[#allocation13_spill] sm:$0xff] }
 0x108   :  { %855 = vmatprep.subr.mxu1 %v822_v31  ;;  %v725_v37 = vadd.f32 0.2548296, %v717_v47  ;;  %v313_v21 = vadd.f32 -0.28449672, %v305_v3  ;;  %vm789_vm11 = vcmp.lt.f32.partialorder %v1616_v32, 0.0  ;;  %vm394_vm12 = vcmp.lt.f32.partialorder %v1618_v1, 0.0 }
 0x109   :  { %v411_v25 = vsel %vm395_vm10, %v403_v29, %v387_v41  ;;  %v716_v4 = vmul.f32 %v1428_v9, %v708_v33  ;;  %v707_v62 = vadd.f32 -0.28449672, %v699_v46  ;;  %v330_v10 = vadd.f32 0.2548296, %v322_v58  ;;  %v1623_v31 = vld [vmem:[#allocation16_spill] sm:$0xff]  ;;  %v1624_v3 = vld [vmem:[#allocation10_spill] sm:$0xff] }
 0x10a   :  { %v419_v2 = vadd.f32 1.0, %v411_v25  ;;  %v733_v48 = vmul.f32 %v1369_v11, %v725_v37  ;;  %v321_v5 = vmul.f32 %v1388_v42, %v313_v21  ;;  %vm393_vm13 = vcmp.lt.f32.partialorder %v1620_v14, 0.0  ;;  %v1625_v37 = vld [vmem:[#allocation12_spill] sm:$0xff]  ;;  %v29_v25 = vld [vmem:[%s1574_s3] sm:$0xf]  ;;  %s1012_s3 = scalar_lea.vmem %s916_s18, 256 }
 0x10b   :  { %v724_v40 = vadd.f32 0.2548296, %v716_v4  ;;  %v715_v38 = vmul.f32 %v1411_v35, %v707_v62  ;;  %v338_v55 = vmul.f32 %v1391_v13, %v330_v10  ;;  %v218_v13 = vmul.f32 0.5, %v1615_v12  ;;  %p1013_p0 = scmp.ne.s32.totalorder %s916_s18, %s1012_s3  ;;  %p1018_p2 = scmp.lt.s32.totalorder %s1012_s3, %s1012_s3 }
 0x10c   :  { %v427_v45 = vmul.f32 %v419_v2, %v219_v44  ;;  %v773_v27 = vmul.f32 %v1612_v43, %v733_v48  ;;  %v329_v57 = vadd.f32 0.2548296, %v321_v5  ;;  %vm788_vm14 = vcmp.lt.f32.partialorder %v1621_v61, 0.0  ;;  %v436_v2 = vpop.permute.xlu0 %435 }
 0x10d   :  { %v732_v28 = vmul.f32 %v1428_v9, %v724_v40  ;;  %v723_v49 = vadd.f32 0.2548296, %v715_v38  ;;  %v378_v52 = vmul.f32 %v1613_v19, %v338_v55  ;;  %v612_v53 = vmul.f32 0.5, %v1622_v60  ;;  %p1019_p3 = por %p1018_p2, %p1017_p1 }
 0x10e   :  { %471 = vmatpush1.msra.mxu0 %v427_v45  ;;  %v781_v51 = vsub.f32 1.0, %v773_v27  ;;  %v337_v11 = vmul.f32 %v1388_v42, %v329_v57  ;;  %vm787_vm15 = vcmp.lt.f32.partialorder %v1623_v31, 0.0  ;;  %v217_v29 = vmul.f32 0.5, %v1624_v3 }
 0x10f   :  { %v772_v34 = vmul.f32 %v1505_v26, %v732_v28  ;;  %v731_v6 = vmul.f32 %v1411_v35, %v723_v49  ;;  %v386_v39 = vsub.f32 1.0, %v378_v52  ;;  %v613_v26 = vmul.f32 0.5, %v1619_v22  ;;  %p1020_p4 = pnand %p1019_p3, %p1013_p0 }
 0x110   :  { %v797_v63 = vsub.f32 0.0, %v781_v51  ;;  %v377_v16 = vmul.f32 %v1614_v20, %v337_v11  ;;  %v611_v58 = vmul.f32 0.5, %v1625_v37  ;;  %vm438_vm0 = vcmask 261120  }
 0x111   :  { %v780_v9 = vsub.f32 1.0, %v772_v34  ;;  %v771_v18 = vmul.f32 %v1617_v17, %v731_v6  ;;  %v402_v8 = vsub.f32 0.0, %v386_v39  ;;  %vm904_vm1 = vcmask 1043456  }
 0x112   :  { %v805_v36 = vsel %vm789_vm11, %v797_v63, %v781_v51  ;;  %v385_v42 = vsub.f32 1.0, %v377_v16 }
 0x113   :  { %v813_v0 = vadd.f32 1.0, %v805_v36  ;;  %v796_v35 = vsub.f32 0.0, %v780_v9  ;;  %v779_v54 = vsub.f32 1.0, %v771_v18  ;;  %v410_v15 = vsel %vm394_vm12, %v402_v8, %v386_v39 }
 0x114   :  { %v401_v7 = vsub.f32 0.0, %v385_v42  ;;  %v418_v56 = vadd.f32 1.0, %v410_v15 }
 0x115   :  { %v821_v59 = vmul.f32 %v813_v0, %v613_v26  ;;  %v804_v23 = vsel %vm788_vm14, %v796_v35, %v780_v9  ;;  %v795_v41 = vsub.f32 0.0, %v779_v54 }
 0x116   :  { %v812_v47 = vadd.f32 1.0, %v804_v23  ;;  %v409_v24 = vsel %vm393_vm13, %v401_v7, %v385_v42  ;;  %v426_v33 = vmul.f32 %v418_v56, %v218_v13 }
 0x117   :  { %856 = vmatpush1.msra.mxu1 %v821_v59  ;;  %v417_v46 = vadd.f32 1.0, %v409_v24  ;;  %v803_v30 = vsel %vm787_vm15, %v795_v41, %v779_v54 }
 0x118   :  { %v820_v21 = vmul.f32 %v812_v47, %v612_v53  ;;  %v811_v50 = vadd.f32 1.0, %v803_v30  ;;  %472 = vmatprep.subr.mxu0 %v426_v33 }
 0x119   :  { %v425_v44 = vmul.f32 %v417_v46, %v217_v29 }
 0x11a   :  { %857 = vmatprep.subr.mxu1 %v820_v21  ;;  %v819_v4 = vmul.f32 %v811_v50, %v611_v58 }
 0x11b   :  { %473 = vmatpush1.msra.mxu0 %v425_v44 }
 0x11c   :  { %858 = vmatpush1.msra.mxu1 %v819_v4  ;;  %923 = vmatmul.mubr.msk.f32.vlgmr.msra.gmra.mxu0 %vm438_vm0, %v29_v25 }
 0x11d   :  { %924 = vmatmul.mubr.msk.f32.vlgmr.msra.gmra.mxu1 %vm438_vm0, %v29_v25 }
 0x1dc   :  { %v508_v62 = vpop.f32.mrf.mxu0 }
 0x1dd   :  { %v893_v48 = vpop.f32.mrf.mxu1  ;;  %v509_v38 = vadd.f32 %v508_v62, %v436_v2 }
 0x1de   :  { %v894_v10 = vadd.f32 %v893_v48, %v436_v2  ;;  %v510_v5 = vpop.f32.mrf.mxu0 }
 0x1df   :  { %v895_v40 = vpop.f32.mrf.mxu1  ;;  %v511_v27 = vadd.f32 %v510_v5, %v436_v2 }
 0x1e0   :  { %v900_v45 = vrot.slane %v894_v10, 4  ;;  %v896_v43 = vadd.f32 %v895_v40, %v436_v2 }
 0x1e2   :  { %v901_v55 = vrot.slane %v896_v43, 4  ;;  %v905_v57 = vsel %vm904_vm1, %v509_v38, %v900_v45 }
 0x1e3   :  { %907 = vst [vmem:[#allocation2] sm:$0xff] %v905_v57 }
 0x1e4   :  { %v906_v28 = vsel %vm904_vm1, %v511_v27, %v901_v55 }
 0x1e5   :  { %908 = vst [vmem:[#allocation2 + $0x8] sm:$0xff] %v906_v28 }
 0x1e6   :  { %1023 = shalt.err (!%p1020_p4)
}
 0x1e7   :  { %918 = dma.vmem_to_hbm [thread:$0]  %s916_s18, 256, %s1576_s5, [#allocation3]  }
 0x1e8   :  { %1032 = dma.done.wait [#allocation3], 256  }
 0x1e9   :  { %1033 = vsyncadd [#allocation3], 4294967040 }
 0x1ea   :  { %922 = vsyncpa [#allocation3], 1 }

</bundles_post_ra>
